<compile_context>
chip_gen: v6e
topology: v6e:2x2x1
jax: 0.10.0
libtpu: 0.0.40
codegen_flags: <defaults>
</compile_context>

<pallas_src>
import functools

import jax
import jax.numpy as jnp
from jax.experimental import pallas as pl
from jax.experimental.pallas import tpu as pltpu


def _zparams_kernel(r_ref, w_ref, b_ref, out_ref, *, z_dim):
    # One fused MXU matmul with f32 accumulation; bias add is VPU filler.
    fused = jnp.dot(r_ref[...], w_ref[...],
                    preferred_element_type=jnp.float32) + b_ref[...]

    # z_std = exp(0.5 * softplus(x)) == sqrt(1 + exp(x)); numerically stable:
    #   exp(0.5 * max(x, 0)) * sqrt(1 + exp(-|x|))
    std_all = jnp.exp(0.5 * jnp.maximum(fused, 0.0)) * jnp.sqrt(
        1.0 + jnp.exp(-jnp.abs(fused)))

    # Lane-select instead of lane-slicing: columns [0, z_dim) carry the mean,
    # columns [z_dim, 2*z_dim) carry the std.  Single full-width store.
    col = jax.lax.broadcasted_iota(jnp.int32, fused.shape, 1)
    out = jnp.where(col < z_dim, fused, std_all)
    out_ref[...] = out.astype(out_ref.dtype)


def zparams_forward(r, w_mean, b_mean, w_logvar, b_logvar, *, tile_b=None):
    """r: (B, r_dim); w_*: (r_dim, z_dim); b_*: (z_dim,).

    Returns (z_mean, z_std), each (B, z_dim, 1), matching Zparams.forward.
    """
    B, r_dim = r.shape
    z_dim = w_mean.shape[1]

    # Fuse both Linear layers: one (r_dim, 2*z_dim) weight, one (1, 2*z_dim) bias.
    w = jnp.concatenate([w_mean, w_logvar], axis=1)
    b = jnp.concatenate([b_mean, b_logvar]).reshape(1, 2 * z_dim)

    if tile_b is None:
        # Large enough to amortize per-step overhead; small enough that the
        # double-buffered (tile_b, r_dim) + (tile_b, 2*z_dim) tiles plus the
        # resident weights stay far under v7x's 32 MiB scoped-VMEM default.
        tile_b = min(B, 1024)
    if tile_b != B:
        tile_b = max(8, (tile_b // 8) * 8)  # honor the (8, 128) block rule

    grid = (pl.cdiv(B, tile_b),)

    out = pl.pallas_call(
        functools.partial(_zparams_kernel, z_dim=z_dim),
        out_shape=jax.ShapeDtypeStruct((B, 2 * z_dim), r.dtype),
        grid=grid,
        in_specs=[
            pl.BlockSpec((tile_b, r_dim), lambda i: (i, 0)),        # batch tile
            pl.BlockSpec((r_dim, 2 * z_dim), lambda i: (0, 0)),     # VMEM-resident
            pl.BlockSpec((1, 2 * z_dim), lambda i: (0, 0)),         # VMEM-resident
        ],
        out_specs=pl.BlockSpec((tile_b, 2 * z_dim), lambda i: (i, 0)),
        compiler_params=pltpu.CompilerParams(
            dimension_semantics=("parallel",)),
    )(r, w, b)

    z_mean = out[:, :z_dim][..., None]
    z_std = out[:, z_dim:][..., None]
    return z_mean, z_std


def init_params(key, r_dim, z_dim, dtype=jnp.float32):
    # Mimic torch.nn.Linear default init: U(-1/sqrt(in), 1/sqrt(in)).
    k1, k2, k3, k4 = jax.random.split(key, 4)
    bound = 1.0 / jnp.sqrt(jnp.asarray(r_dim, dtype))
    w_mean = jax.random.uniform(k1, (r_dim, z_dim), dtype, -bound, bound)
    b_mean = jax.random.uniform(k2, (z_dim,), dtype, -bound, bound)
    w_logvar = jax.random.uniform(k3, (r_dim, z_dim), dtype, -bound, bound)
    b_logvar = jax.random.uniform(k4, (z_dim,), dtype, -bound, bound)
    return w_mean, b_mean, w_logvar, b_logvar


if __name__ == "__main__":
    key = jax.random.PRNGKey(0)
    B, r_dim, z_dim = 8, 32, 16

    k_r, k_p = jax.random.split(key)
    r = jax.random.normal(k_r, (B, r_dim), jnp.float32)
    w_mean, b_mean, w_logvar, b_logvar = init_params(k_p, r_dim, z_dim)

    z_mean, z_std = zparams_forward(r, w_mean, b_mean, w_logvar, b_logvar)
    jax.block_until_ready((z_mean, z_std))

    # Reference check in plain JAX (matches the PyTorch forward).
    ref_mean = (r @ w_mean + b_mean)[..., None]
    ref_std = jnp.exp(0.5 * jax.nn.softplus(r @ w_logvar + b_logvar))[..., None]
    assert z_mean.shape == (B, z_dim, 1) and z_std.shape == (B, z_dim, 1)
    assert jnp.allclose(z_mean, ref_mean, atol=1e-5, rtol=1e-5)
    assert jnp.allclose(z_std, ref_std, atol=1e-5, rtol=1e-5)

    print("KERNEL_OK")
</pallas_src>

<mosaic_0001>
module attributes {stable_mosaic.version = 11 : i64} {
  func.func @_zparams_kernel(%arg0: i32, %arg1: memref<8x32xf32, #tpu.memory_space<vmem>>, %arg2: memref<32x32xf32, #tpu.memory_space<vmem>>, %arg3: memref<1x32xf32, #tpu.memory_space<vmem>>, %arg4: memref<8x32xf32, #tpu.memory_space<vmem>>) attributes {dimension_semantics = [#tpu.dimension_semantics<parallel>], iteration_bounds = array<i64: 1>, scalar_prefetch = 0 : i64, scratch_operands = 0 : i64, tpu.core_type = #tpu.core_type<tc>, window_params = [{transform_indices = @transform_0, window_bounds = array<i64: 8, 32>}, {pipeline_mode = #tpu.pipeline_mode<synchronous>, transform_indices = @transform_1, window_bounds = array<i64: 32, 32>}, {pipeline_mode = #tpu.pipeline_mode<synchronous>, transform_indices = @transform_2, window_bounds = array<i64: 1, 32>}, {transform_indices = @transform_3, window_bounds = array<i64: 8, 32>}]} {
    %c0 = arith.constant 0 : index
    %c0_0 = arith.constant 0 : index
    %0 = vector.load %arg1[%c0, %c0_0] : memref<8x32xf32, #tpu.memory_space<vmem>>, vector<8x32xf32>
    %c0_1 = arith.constant 0 : index
    %c0_2 = arith.constant 0 : index
    %1 = vector.load %arg2[%c0_1, %c0_2] : memref<32x32xf32, #tpu.memory_space<vmem>>, vector<32x32xf32>
    %cst = arith.constant dense<0.000000e+00> : vector<8x32xf32>
    %2 = tpu.matmul %0, %1, %cst {dimension_numbers = #tpu.dot_dimension_numbers<[1], [0], [0], [1], [0, 0, 1, 1], [], []>} : vector<8x32xf32>, vector<32x32xf32>, vector<8x32xf32> -> vector<8x32xf32>
    %c0_3 = arith.constant 0 : index
    %c0_4 = arith.constant 0 : index
    %3 = vector.load %arg3[%c0_3, %c0_4] : memref<1x32xf32, #tpu.memory_space<vmem>>, vector<1x32xf32>
    %4 = vector.broadcast %3 : vector<1x32xf32> to vector<8x32xf32>
    %5 = arith.addf %2, %4 : vector<8x32xf32>
    %cst_5 = arith.constant 0.000000e+00 : f32
    %6 = vector.broadcast %cst_5 : f32 to vector<8x32xf32>
    %7 = arith.maximumf %5, %6 : vector<8x32xf32>
    %cst_6 = arith.constant 5.000000e-01 : f32
    %8 = vector.broadcast %cst_6 : f32 to vector<8x32xf32>
    %9 = arith.mulf %8, %7 : vector<8x32xf32>
    %10 = math.exp %9 : vector<8x32xf32>
    %11 = math.absf %5 : vector<8x32xf32>
    %cst_7 = arith.constant 0.000000e+00 : f32
    %12 = vector.broadcast %cst_7 : f32 to vector<8x32xf32>
    %13 = arith.subf %12, %11 : vector<8x32xf32>
    %14 = math.exp %13 : vector<8x32xf32>
    %cst_8 = arith.constant 1.000000e+00 : f32
    %15 = vector.broadcast %cst_8 : f32 to vector<8x32xf32>
    %16 = arith.addf %15, %14 : vector<8x32xf32>
    %17 = math.sqrt %16 : vector<8x32xf32>
    %18 = arith.mulf %10, %17 : vector<8x32xf32>
    %19 = tpu.iota {dimensions = array<i32: 1>} : vector<8x32xi32>
    %c16_i32 = arith.constant 16 : i32
    %20 = vector.broadcast %c16_i32 : i32 to vector<8x32xi32>
    %21 = arith.cmpi slt, %19, %20 : vector<8x32xi32>
    %22 = arith.select %21, %5, %18 : vector<8x32xi1>, vector<8x32xf32>
    %c0_9 = arith.constant 0 : index
    %c0_10 = arith.constant 0 : index
    %23 = vector.load %arg4[%c0_9, %c0_10] : memref<8x32xf32, #tpu.memory_space<vmem>>, vector<8x32xf32>
    tpu.vector_store %arg4[%c0_9, %c0_10], %22 {strides = array<i32>} : memref<8x32xf32, #tpu.memory_space<vmem>>, vector<8x32xf32>,
    return
  }
  func.func @transform_0(%arg0: i32) -> (i32, i32) {
    %c0_i32 = arith.constant 0 : i32
    %c0_i32_0 = arith.constant 0 : i32
    return %arg0, %c0_i32 : i32, i32
  }
  func.func @transform_1(%arg0: i32) -> (i32, i32) {
    %c0_i32 = arith.constant 0 : i32
    %c0_i32_0 = arith.constant 0 : i32
    %c0_i32_1 = arith.constant 0 : i32
    return %c0_i32, %c0_i32_0 : i32, i32
  }
  func.func @transform_2(%arg0: i32) -> (i32, i32) {
    %c0_i32 = arith.constant 0 : i32
    %c0_i32_0 = arith.constant 0 : i32
    %c0_i32_1 = arith.constant 0 : i32
    return %c0_i32, %c0_i32_0 : i32, i32
  }
  func.func @transform_3(%arg0: i32) -> (i32, i32) {
    %c0_i32 = arith.constant 0 : i32
    %c0_i32_0 = arith.constant 0 : i32
    return %arg0, %c0_i32 : i32, i32
  }
}

</mosaic_0001>

<bundles_post_ra>
// kernel: tpu_custom_call.1
= control target key start
LH: loop header
LB: loop body
LE: loop exit
PB: predicated region body
PF: predicated region fallthrough
CT: control target
= control target key end

     0   :  { %8 = vsyncpa [#allocation3], 0  ;;  %s303_s0 = inlined_call_operand.hbm [shape: f32[8,32], index: 0, kind: input, shape index: {}]   ;;  %s304_s1 = inlined_call_operand.hbm [shape: f32[32,32], index: 1, kind: input, shape index: {}]   ;;  %s305_s2 = inlined_call_operand.vmem [shape: f32[1,32], index: 2, kind: input, shape index: {}]   ;;  %s306_s3 = inlined_call_operand.hbm [shape: f32[8,32], index: 3, kind: output, shape index: {}]  }
   0x1   :  { %9 = vsyncpa [#allocation6], 0 }
   0x2   :  { %10 = vsyncpa [#allocation4], 0  ;;  %s262_s12 = smov [#allocation2]   ;;  %s263_s14 = smov [#allocation5]  }
   0x3   :  { %s17_s13 = sshll.u32 %s262_s12, 4  ;;  %s26_s15 = sshll.u32 %s263_s14, 4  ;;  %s18_s13 = int_to_ptr.vmem [resolvable:$true] %s17_s13  ;;  %s27_s15 = int_to_ptr.vmem [resolvable:$true] %s26_s15 }
   0x4   :  { %s204_s16 = scalar_lea.vmem %s18_s13, 128  ;;  %p209_p1 = scmp.lt.s32.totalorder %s18_s13, %s18_s13 }
   0x5   :  { %p205_p0 = scmp.ne.s32.totalorder %s18_s13, %s204_s16  ;;  %p210_p2 = scmp.lt.s32.totalorder %s204_s16, %s204_s16 }
   0x7   :  { %p211_p3 = por %p210_p2, %p209_p1 }
   0x9   :  { %p212_p4 = pnand %p211_p3, %p205_p0 }
   0xb   :  { %215 = shalt.err (!%p212_p4)
}
   0xc   :  { %20 = dma.hbm_to_vmem [thread:$0]  %s303_s0, 128, %s18_s13, [#allocation3]  }
   0xd   :  { %s224_s19 = scalar_lea.vmem %s27_s15, 512  ;;  %p229_p6 = scmp.lt.s32.totalorder %s27_s15, %s27_s15 }
   0xe   :  { %p225_p5 = scmp.ne.s32.totalorder %s27_s15, %s224_s19  ;;  %p230_p7 = scmp.lt.s32.totalorder %s224_s19, %s224_s19 }
  0x10   :  { %p231_p8 = por %p230_p7, %p229_p6 }
  0x12   :  { %p232_p9 = pnand %p231_p8, %p225_p5 }
  0x14   :  { %235 = shalt.err (!%p232_p9)
}
  0x15   :  { %s264_s20 = smov 128   ;;  %s265_s21 = smov 8  }
  0x16   :  { %32 = dma.hbm_to_vmem [thread:$0]  %s304_s1, 512, %s27_s15, [#allocation6], %s264_s20, %s264_s20, %s265_s21  }
  0x17   :  { %256 = dma.done.wait [#allocation3], 128  }
  0x18   :  { %257 = vsyncadd [#allocation3], 4294967168 }
  0x19   :  { %258 = dma.done.wait [#allocation6], 512  }
  0x1a   :  { %259 = vsyncadd [#allocation6], 4294966784  ;;  %v266_v0 = vmov 0.0   ;;  %vm267_vm0 = vmmov 0   ;;  %v45_v1 = vld [vmem:[#allocation5 + $0x18] sm:$0xff]  ;;  %v44_v2 = vld [vmem:[#allocation5 + $0x10] sm:$0xff]  ;;  %v144_v18 = vlaneseq }
  0x1b   :  { %172 = vmatprep.subr.mxu0 %v266_v0  ;;  %180 = vmatprep.mubr.msk.f32.mxu0 %vm267_vm0, %v266_v0  ;;  %v43_v3 = vld [vmem:[#allocation5 + $0x8] sm:$0xff]  ;;  %v42_v4 = vld [vmem:[#allocation5] sm:$0xff]  ;;  %v41_v5 = vld [vmem:[#allocation2] sm:$0xff]  ;;  %vm53_vm1 = vcmask 261120  }
  0x1c   :  { %173 = vmatpush3.msra.mxu0 %v45_v1  ;;  %v165_v6 = vld [vmem:[%s305_s2] ss:$0 sm:$0xff]  ;;  %v145_v20 = vand.u32 127, %v144_v18  ;;  %s268_s2 = smov [#allocation7]  }
  0x1d   :  { %174 = vmatprep.subr.mxu0 %v266_v0  ;;  %s155_s24 = sshll.u32 %s268_s2, 4  ;;  %s156_s24 = int_to_ptr.vmem [resolvable:$true] %s155_s24 }
  0x1e   :  { %175 = vmatpush3.msra.mxu0 %v44_v2  ;;  %vm146_vm4 = vcmp.lt.s32.totalorder %v145_v20, 16  ;;  %s236_s25 = scalar_lea.vmem %s156_s24, 128  ;;  %p241_p11 = scmp.lt.s32.totalorder %s156_s24, %s156_s24 }
  0x1f   :  { %176 = vmatprep.subr.mxu0 %v266_v0  ;;  %p237_p10 = scmp.ne.s32.totalorder %s156_s24, %s236_s25  ;;  %p242_p12 = scmp.lt.s32.totalorder %s236_s25, %s236_s25 }
  0x20   :  { %177 = vmatpush3.msra.mxu0 %v43_v3 }
  0x21   :  { %178 = vmatprep.subr.mxu0 %v266_v0  ;;  %p243_p13 = por %p242_p12, %p241_p11 }
  0x22   :  { %179 = vmatpush3.msra.mxu0 %v42_v4 }
  0x23   :  { %181 = vmatmul.mubr.msk.f32.vlgmr.msra.gmra.mxu0 %vm53_vm1, %v41_v5  ;;  %p244_p0 = pnand %p243_p13, %p237_p10 }
  0xe3   :  { %v123_v7 = vpop.f32.mrf.mxu0 }
  0xe4   :  { %v124_v8 = vadd.f32 %v165_v6, %v123_v7 }
  0xe5   :  { %v182_v9 = vpop.f32.mrf.mxu0 }
  0xe6   :  { %v131_v10 = vand.u32 2147483647, %v124_v8  ;;  %v127_v13 = vmax.f32 %v124_v8, 0.0 }
  0xe8   :  { %v132_v11 = vsub.f32 0.0, %v131_v10  ;;  %v128_v14 = vmul.f32 0.5, %v127_v13 }
  0xea   :  { %v133_v12 = vmul.f32 1.442695, %v132_v11  ;;  %v129_v17 = vmul.f32 1.442695, %v128_v14 }
  0xec   :  { %190 = vpow2.f32 %v133_v12 }
  0xf9   :  { %v191_v15 = vpop.eup %190 }
  0xfa   :  { %v135_v16 = vadd.f32 1.0, %v191_v15 }
  0xfc   :  { %192 = vrsqrt.f32 %v135_v16  ;;  %vm138_vm2 = vcmp.eq.f32.partialorder %v135_v16, inf  ;;  %v141_v22 = vand.u32 2147483648, %v135_v16  ;;  %vm140_vm3 = vcmp.eq.f32.partialorder %v135_v16, 0.0 }
  0xfd   :  { %194 = vpow2.f32 %v129_v17 }
 0x109   :  { %v193_v19 = vpop.eup %192 }
 0x10a   :  { %v137_v21 = vmul.f32 %v193_v19, %v135_v16  ;;  %v195_v24 = vpop.eup %194 }
 0x10c   :  { %v139_v23 = vsel %vm138_vm2, %v135_v16, %v137_v21 }
 0x10d   :  { %v142_v25 = vsel %vm140_vm3, %v141_v22, %v139_v23 }
 0x10e   :  { %v143_v26 = vmul.f32 %v195_v24, %v142_v25 }
 0x110   :  { %v147_v27 = vsel %vm146_vm4, %v124_v8, %v143_v26 }
 0x111   :  { %148 = vst.msk [vmem:[#allocation7] sm:$0xff] %vm53_vm1, %v147_v27 }
 0x112   :  { %247 = shalt.err (!%p244_p0)
}
 0x113   :  { %158 = dma.vmem_to_hbm [thread:$0]  %s156_s24, 128, %s306_s3, [#allocation4]  }
 0x114   :  { %260 = dma.done.wait [#allocation4], 128  }
 0x115   :  { %261 = vsyncadd [#allocation4], 4294967168 }
 0x116   :  { %162 = vsyncpa [#allocation3], 1 }
 0x117   :  { %163 = vsyncpa [#allocation6], 1 }
 0x118   :  { %164 = vsyncpa [#allocation4], 1 }

</bundles_post_ra>
